<compile_context>
chip_gen: v6e
topology: v6e:2x2x1
jax: 0.10.0
libtpu: 0.0.40
codegen_flags: <defaults>
</compile_context>

<pallas_src>
import functools

import jax
import jax.numpy as jnp
from jax import lax
from jax.experimental import pallas as pl
from jax.experimental.pallas import tpu as pltpu

FEATURE_DIM = 512            # 'ViT-B' branch of the module


def _round_up(x, m):
    return -(-x // m) * m


def _hw_params():
    """Per-generation tile sizes and scoped-VMEM limit.

    Defaults are the safe ceiling for v7x (64 MiB physical VMEM); v5e/v6e (128 MiB)
    get 2x larger tiles and a ~100 MiB limit.
    """
    tk, tn, vmem = 8192, 2048, 48 * 1024 * 1024
    try:
        cap = getattr(pltpu.get_tpu_info(), "vmem_capacity_bytes", 0) or 0
        if cap >= 100 * 1024 * 1024:          # v5e / v6e
            tk, tn, vmem = 16384, 4096, 100 * 1024 * 1024
    except Exception:
        pass
    return tk, tn, vmem


_TK_DEFAULT, _TN_DEFAULT, _VMEM_LIMIT = _hw_params()


# ----------------------------------------------------------------------------- encode kernel
def _encode_kernel(x_ref, w_ref, o_ref):
    # emb = x @ W (bf16 MXU inputs, f32 accumulation directly in the resident output
    # block), then F.normalize(dim=-1) in f32 via rsqrt (EUP slot) at the last K step.
    kk = pl.program_id(1)

    @pl.when(kk == 0)
    def _():
        o_ref[...] = jnp.zeros_like(o_ref)

    o_ref[...] += jnp.dot(x_ref[...], w_ref[...], preferred_element_type=jnp.float32)

    @pl.when(kk == pl.num_programs(1) - 1)
    def _():
        emb = o_ref[...]                                       # f32
        sq = jnp.sum(emb * emb, axis=-1, keepdims=True)
        o_ref[...] = emb * lax.rsqrt(jnp.maximum(sq, 1e-24))   # == x / max(||x||, 1e-12)


def prepare_encoder_weight(w_f32, tk=None):
    """One-time setup: cast the frozen visual-encoder weight to bf16 and pad K to a
    multiple of the (clamped) K tile. Returns (padded_weight, effective_tk)."""
    tk = _TK_DEFAULT if tk is None else tk
    f_in, d = w_f32.shape
    assert d == FEATURE_DIM
    tk_eff = min(tk, _round_up(f_in, 128))      # don't over-pad small inputs
    f_pad = _round_up(f_in, tk_eff)
    w = jnp.pad(w_f32, ((0, f_pad - f_in), (0, 0))).astype(jnp.bfloat16)
    # TODO(synk): int8 (v5e/v6e) / fp8-e4m3 (v7x) weight quantization with per-column
    # scales would halve the dominant W HBM stream again; needs accuracy validation.
    return w, tk_eff


def encode_images(images_nchw, w_bf16, tk_eff):
    """CLIP-style create_embeddings: frozen linear visual encoder + L2 normalize.
    (M parallel, K arbitrary) grid, double-buffered BlockSpec pipeline, f32 output."""
    b = images_nchw.shape[0]
    x = images_nchw.reshape(b, -1)                            # (B, C*H*W), lane = features
    f_in = x.shape[1]
    f_pad = w_bf16.shape[0]
    assert f_pad % tk_eff == 0 and f_pad >= f_in

    b_pad = _round_up(max(b, 16), 16)                         # bf16 packs 2 rows/sublane
    tm = 256 if b_pad > 256 else b_pad
    b_pad = _round_up(b_pad, tm)
    x = jnp.pad(x, ((0, b_pad - b), (0, f_pad - f_in))).astype(jnp.bfloat16)

    out = pl.pallas_call(
        _encode_kernel,
        out_shape=jax.ShapeDtypeStruct((b_pad, FEATURE_DIM), jnp.float32),
        grid_spec=pltpu.PrefetchScalarGridSpec(
            num_scalar_prefetch=0,
            grid=(b_pad // tm, f_pad // tk_eff),
            in_specs=[
                pl.BlockSpec((tm, tk_eff), lambda m, kk: (m, kk)),
                pl.BlockSpec((tk_eff, FEATURE_DIM), lambda m, kk: (kk, 0)),
            ],
            out_specs=pl.BlockSpec((tm, FEATURE_DIM), lambda m, kk: (m, 0)),
        ),
        compiler_params=pltpu.CompilerParams(
            dimension_semantics=("parallel", "arbitrary"),    # M parallel, K reduction
            vmem_limit_bytes=_VMEM_LIMIT,
        ),
    )(x, w_bf16)
    return out[:b]


# ----------------------------------------------------------------------------- fused k-NN kernel
def _knn_kernel(q_ref, s_ref, d_ref, i_ref, bestv_ref, besti_ref, *, n_real, tn, k):
    # Unit-norm embeddings: ||q - s||^2 = 2 - 2*(q . s). Each N tile's distances are merged
    # into a carried (B, k) best-distance/index state; padded columns are masked to +inf.
    j = pl.program_id(0)

    @pl.when(j == 0)
    def _():
        bestv_ref[...] = jnp.full(bestv_ref.shape, jnp.inf, jnp.float32)
        besti_ref[...] = jnp.zeros(besti_ref.shape, jnp.float32)

    dots = lax.dot_general(q_ref[...], s_ref[...],
                           dimension_numbers=(((1,), (1,)), ((), ())),
                           preferred_element_type=jnp.float32)       # (B, tn), no transpose
    dist = jnp.maximum(2.0 - 2.0 * dots, 0.0)

    bq = dist.shape[0]
    lane_i = lax.broadcasted_iota(jnp.int32, (bq, tn), 1)
    dist = jnp.where(lane_i + j * tn < n_real, dist, jnp.inf)        # mask padded support cols

    lane_f = lane_i.astype(jnp.float32)
    col_f = lane_f + (j * tn).astype(jnp.float32)                    # global col id (exact < 2^24)
    slot_f = lax.broadcasted_iota(jnp.int32, (bq, k), 1).astype(jnp.float32)

    bestv = bestv_ref[...]
    besti = besti_ref[...]
    for _ in range(k):                       # stream this tile's k smallest into the carry
        m = jnp.min(dist, axis=-1, keepdims=True)                    # tile min
        pos = jnp.min(jnp.where(dist == m, lane_f, jnp.inf), axis=-1, keepdims=True)
        sel = lane_f == pos
        cand_i = jnp.sum(jnp.where(sel, col_f, 0.0), axis=-1, keepdims=True)
        dist = jnp.where(sel, jnp.inf, dist)
        # replace the current worst carried entry iff the candidate beats it
        worst = jnp.max(bestv, axis=-1, keepdims=True)
        wpos = jnp.min(jnp.where(bestv == worst, slot_f, jnp.inf), axis=-1, keepdims=True)
        take = jnp.logical_and(slot_f == wpos, m < worst)
        bestv = jnp.where(take, m, bestv)
        besti = jnp.where(take, cand_i, besti)
    bestv_ref[...] = bestv
    besti_ref[...] = besti

    @pl.when(j == pl.num_programs(0) - 1)
    def _():
        wv = bestv_ref[...]
        wi = besti_ref[...]
        ov = jnp.zeros_like(wv)
        oi = jnp.zeros_like(wi)
        for t in range(k):                   # ascending selection sort of the k carried hits
            m = jnp.min(wv, axis=-1, keepdims=True)
            pos = jnp.min(jnp.where(wv == m, slot_f, jnp.inf), axis=-1, keepdims=True)
            sel = slot_f == pos
            iv = jnp.sum(jnp.where(sel, wi, 0.0), axis=-1, keepdims=True)
            dest = slot_f == float(t)
            ov = jnp.where(dest, m, ov)
            oi = jnp.where(dest, iv, oi)
            wv = jnp.where(sel, jnp.inf, wv)
        d_ref[...] = ov
        i_ref[...] = oi.astype(jnp.int32)


def knn_search(query_embs, support_embs_bf16, k=3, tn=None):
    """Exact k-NN over unit-norm embeddings: fused distances + streaming top-k, so the
    (B, N) distance matrix never touches HBM. N is tiled on an 'arbitrary' (carried) axis."""
    tn = _TN_DEFAULT if tn is None else tn
    b, d = query_embs.shape
    n = support_embs_bf16.shape[0]
    assert support_embs_bf16.shape[1] == d

    tn_eff = min(tn, _round_up(n, 128))
    n_pad = _round_up(n, tn_eff)
    b_pad = _round_up(max(b, 16), 16)
    q_p = jnp.pad(query_embs, ((0, b_pad - b), (0, 0))).astype(jnp.bfloat16)
    s_p = jnp.pad(support_embs_bf16, ((0, n_pad - n), (0, 0)))

    kernel = functools.partial(_knn_kernel, n_real=n, tn=tn_eff, k=k)
    d_out, i_out = pl.pallas_call(
        kernel,
        out_shape=(jax.ShapeDtypeStruct((b_pad, k), jnp.float32),
                   jax.ShapeDtypeStruct((b_pad, k), jnp.int32)),
        grid_spec=pltpu.PrefetchScalarGridSpec(
            num_scalar_prefetch=0,
            grid=(n_pad // tn_eff,),
            in_specs=[
                pl.BlockSpec((b_pad, d), lambda j: (0, 0)),     # queries stay resident
                pl.BlockSpec((tn_eff, d), lambda j: (j, 0)),    # stream bf16 support tiles
            ],
            out_specs=[
                pl.BlockSpec((b_pad, k), lambda j: (0, 0)),
                pl.BlockSpec((b_pad, k), lambda j: (0, 0)),
            ],
            scratch_shapes=[pltpu.VMEM((b_pad, k), jnp.float32),
                            pltpu.VMEM((b_pad, k), jnp.float32)],
        ),
        compiler_params=pltpu.CompilerParams(
            dimension_semantics=("arbitrary",),                 # carried top-k state across N
            vmem_limit_bytes=_VMEM_LIMIT,
        ),
    )(q_p, s_p)
    return d_out[:b], i_out[:b]


# ----------------------------------------------------------------------------- forward wrapper
def search_forward(query_images, w_bf16, tk_eff, support_embs_bf16, support_labels, k=3):
    """Equivalent of SearchModel.forward: returns (D, I, L) per query image."""
    if query_images.ndim == 3:
        query_images = query_images[None]                       # unsqueeze(0)
    # Note: if query + support images need encoding in the same step, concatenate them
    # along M and call encode_images once — the encode pass is pure W-streaming.
    q_embs = encode_images(query_images, w_bf16, tk_eff)        # Pallas: matmul + normalize
    # TODO(synk): HNSW graph traversal has no Pallas equivalent; exact fused k-NN used instead.
    d_top, idx = knn_search(q_embs, support_embs_bf16, k=k)     # Pallas: fused dist + top-k
    labels = jnp.take(support_labels, idx)
    return d_top, idx, labels


# ----------------------------------------------------------------------------- main
if __name__ == "__main__":
    key = jax.random.PRNGKey(0)
    k_w, k_sup, k_query, k_lab = jax.random.split(key, 4)

    B, C, H, W = 2, 3, 16, 16        # small query batch, NCHW
    N_SUPPORT = 16
    F_IN = C * H * W                 # 768
    K_NN = 3

    # Deterministic frozen "visual encoder" weight; cast/pad to bf16 once at setup.
    w_enc_f32 = (jax.random.normal(k_w, (F_IN, FEATURE_DIM), dtype=jnp.float32)
                 / jnp.sqrt(jnp.float32(F_IN)))
    w_enc, tk_eff = prepare_encoder_weight(w_enc_f32)

    support_images = jax.random.normal(k_sup, (N_SUPPORT, C, H, W), dtype=jnp.float32)
    support_labels = jax.random.randint(k_lab, (N_SUPPORT,), 0, 5, dtype=jnp.int32)
    query_images = jax.random.normal(k_query, (B, C, H, W), dtype=jnp.float32)

    # add_support_set: embed support images (Pallas) and store the bf16 "index".
    support_embs = encode_images(support_images, w_enc, tk_eff)
    support_index = support_embs.astype(jnp.bfloat16)           # halves HBM stream in search

    # forward
    D, I, L = search_forward(query_images, w_enc, tk_eff, support_index, support_labels,
                             k=K_NN)
    jax.block_until_ready((D, I, L))

    # pure-JAX reference on the same bf16 inputs (validates the fused top-k + masking)
    q_embs = encode_images(query_images, w_enc, tk_eff)
    q_bf = q_embs.astype(jnp.bfloat16).astype(jnp.float32)
    s_bf = support_index.astype(jnp.float32)
    d_full = jnp.maximum(2.0 - 2.0 * (q_bf @ s_bf.T), 0.0)
    d_ref = -lax.top_k(-d_full, K_NN)[0]

    # package like the module's list-of-dicts result (glue only)
    result = [{"D": D[i], "I": I[i], "L": L[i]} for i in range(D.shape[0])]
    assert len(result) == B and result[0]["D"].shape == (K_NN,)
    assert bool(jnp.all(D >= 0.0)) and bool(jnp.all(D[:, :-1] <= D[:, 1:]))
    assert bool(jnp.all(I >= 0)) and bool(jnp.all(I < N_SUPPORT))
    assert bool(jnp.allclose(D, d_ref, atol=3e-3))

    print("KERNEL_OK")
</pallas_src>

<mosaic_0001>
module attributes {stable_mosaic.version = 11 : i64} {
  func.func @_encode_kernel(%arg0: i32, %arg1: i32, %arg2: memref<16x768xbf16, #tpu.memory_space<vmem>>, %arg3: memref<768x512xbf16, #tpu.memory_space<vmem>>, %arg4: memref<16x512xf32, #tpu.memory_space<vmem>>) attributes {dimension_semantics = [#tpu.dimension_semantics<parallel>, #tpu.dimension_semantics<arbitrary>], iteration_bounds = array<i64: 1, 1>, scalar_prefetch = 0 : i64, scratch_operands = 0 : i64, tpu.core_type = #tpu.core_type<tc>, window_params = [{transform_indices = @transform_0, window_bounds = array<i64: 16, 768>}, {transform_indices = @transform_1, window_bounds = array<i64: 768, 512>}, {transform_indices = @transform_2, window_bounds = array<i64: 16, 512>}]} {
    %c0_i32 = arith.constant 0 : i32
    %0 = arith.cmpi eq, %arg1, %c0_i32 : i32
    %1 = arith.extui %0 : i1 to i32
    %c0_i32_0 = arith.constant 0 : i32
    %2 = arith.cmpi ne, %1, %c0_i32_0 : i32
    scf.if %2 {
      %cst_10 = arith.constant 0.000000e+00 : f32
      %12 = vector.broadcast %cst_10 : f32 to vector<16x512xf32>
      %c0_11 = arith.constant 0 : index
      %c0_12 = arith.constant 0 : index
      %13 = vector.load %arg4[%c0_11, %c0_12] : memref<16x512xf32, #tpu.memory_space<vmem>>, vector<16x512xf32>
      tpu.vector_store %arg4[%c0_11, %c0_12], %12 {strides = array<i32>} : memref<16x512xf32, #tpu.memory_space<vmem>>, vector<16x512xf32>,
    } else {
    }
    %c0 = arith.constant 0 : index
    %c0_1 = arith.constant 0 : index
    %3 = vector.load %arg4[%c0, %c0_1] : memref<16x512xf32, #tpu.memory_space<vmem>>, vector<16x512xf32>
    %c0_2 = arith.constant 0 : index
    %c0_3 = arith.constant 0 : index
    %4 = vector.load %arg2[%c0_2, %c0_3] : memref<16x768xbf16, #tpu.memory_space<vmem>>, vector<16x768xbf16>
    %c0_4 = arith.constant 0 : index
    %c0_5 = arith.constant 0 : index
    %5 = vector.load %arg3[%c0_4, %c0_5] : memref<768x512xbf16, #tpu.memory_space<vmem>>, vector<768x512xbf16>
    %cst = arith.constant dense<0.000000e+00> : vector<16x512xf32>
    %6 = tpu.matmul %4, %5, %cst {dimension_numbers = #tpu.dot_dimension_numbers<[1], [0], [0], [1], [0, 0, 1, 1], [], []>} : vector<16x768xbf16>, vector<768x512xbf16>, vector<16x512xf32> -> vector<16x512xf32>
    %7 = arith.addf %3, %6 : vector<16x512xf32>
    %c0_6 = arith.constant 0 : index
    %c0_7 = arith.constant 0 : index
    %8 = vector.load %arg4[%c0_6, %c0_7] : memref<16x512xf32, #tpu.memory_space<vmem>>, vector<16x512xf32>
    tpu.vector_store %arg4[%c0_6, %c0_7], %7 {strides = array<i32>} : memref<16x512xf32, #tpu.memory_space<vmem>>, vector<16x512xf32>,
    %c0_i32_8 = arith.constant 0 : i32
    %9 = arith.cmpi eq, %arg1, %c0_i32_8 : i32
    %10 = arith.extui %9 : i1 to i32
    %c0_i32_9 = arith.constant 0 : i32
    %11 = arith.cmpi ne, %10, %c0_i32_9 : i32
    scf.if %11 {
      %c0_10 = arith.constant 0 : index
      %c0_11 = arith.constant 0 : index
      %12 = vector.load %arg4[%c0_10, %c0_11] : memref<16x512xf32, #tpu.memory_space<vmem>>, vector<16x512xf32>
      %13 = arith.mulf %12, %12 : vector<16x512xf32>
      %cst_12 = arith.constant dense<0.000000e+00> : vector<16xf32>
      %14 = vector.multi_reduction <add>, %13, %cst_12 [1] : vector<16x512xf32> to vector<16xf32>
      %15 = vector.shape_cast %14 : vector<16xf32> to vector<16x1xf32>
      %cst_13 = arith.constant 1.000000e-24 : f32
      %16 = vector.broadcast %cst_13 : f32 to vector<16x1xf32>
      %17 = arith.maximumf %15, %16 : vector<16x1xf32>
      %18 = math.rsqrt %17 : vector<16x1xf32>
      %19 = vector.broadcast %18 : vector<16x1xf32> to vector<16x512xf32>
      %20 = arith.mulf %12, %19 : vector<16x512xf32>
      %c0_14 = arith.constant 0 : index
      %c0_15 = arith.constant 0 : index
      %21 = vector.load %arg4[%c0_14, %c0_15] : memref<16x512xf32, #tpu.memory_space<vmem>>, vector<16x512xf32>
      tpu.vector_store %arg4[%c0_14, %c0_15], %20 {strides = array<i32>} : memref<16x512xf32, #tpu.memory_space<vmem>>, vector<16x512xf32>,
    } else {
    }
    return
  }
  func.func @transform_0(%arg0: i32, %arg1: i32) -> (i32, i32) {
    %c0_i32 = arith.constant 0 : i32
    return %arg0, %arg1 : i32, i32
  }
  func.func @transform_1(%arg0: i32, %arg1: i32) -> (i32, i32) {
    %c0_i32 = arith.constant 0 : i32
    %c0_i32_0 = arith.constant 0 : i32
    return %arg1, %c0_i32 : i32, i32
  }
  func.func @transform_2(%arg0: i32, %arg1: i32) -> (i32, i32) {
    %c0_i32 = arith.constant 0 : i32
    %c0_i32_0 = arith.constant 0 : i32
    return %arg0, %c0_i32 : i32, i32
  }
}

</mosaic_0001>

<bundles_post_ra>
// kernel: tpu_custom_call.1
= control target key start
LH: loop header
LB: loop body
LE: loop exit
PB: predicated region body
PF: predicated region fallthrough
CT: control target
= control target key end

     0   :  { %7 = vsyncpa [#allocation3], 0  ;;  %s2217_s0 = inlined_call_operand.hbm [shape: bf16[16,768], index: 0, kind: input, shape index: {}]   ;;  %s2218_s1 = inlined_call_operand.hbm [shape: bf16[768,512], index: 1, kind: input, shape index: {}]   ;;  %s2219_s2 = inlined_call_operand.hbm [shape: f32[16,512], index: 2, kind: output, shape index: {}]  }
   0x1   :  { %8 = vsyncpa [#allocation6], 0 }
   0x2   :  { %9 = vsyncpa [#allocation4], 0  ;;  %s2164_s9 = smov [#allocation2]  }
   0x3   :  { %s15_s10 = sshll.u32 %s2164_s9, 4  ;;  %s16_s10 = int_to_ptr.vmem [resolvable:$true] %s15_s10 }
   0x4   :  { %s2106_s11 = scalar_lea.vmem %s16_s10, 768  ;;  %p2111_p1 = scmp.lt.s32.totalorder %s16_s10, %s16_s10 }
   0x5   :  { %p2107_p0 = scmp.ne.s32.totalorder %s16_s10, %s2106_s11  ;;  %p2112_p2 = scmp.lt.s32.totalorder %s2106_s11, %s2106_s11 }
   0x7   :  { %p2113_p3 = por %p2112_p2, %p2111_p1 }
   0x9   :  { %p2114_p4 = pnand %p2113_p3, %p2107_p0 }
   0xb   :  { %2117 = shalt.err (!%p2114_p4)
}
   0xc   :  { %s2165_s12 = smov 384   ;;  %s2166_s13 = smov 24  }
   0xd   :  { %21 = dma.hbm_to_vmem [thread:$0]  %s2217_s0, 768, %s16_s10, [#allocation3], %s2165_s12, %s2165_s12, %s2166_s13  }
   0xe   :  { %s2167_s16 = smov [#allocation5]  }
   0xf   :  { %s27_s17 = sshll.u32 %s2167_s16, 4  ;;  %s28_s17 = int_to_ptr.vmem [resolvable:$true] %s27_s17 }
  0x10   :  { %s2126_s18 = scalar_lea.vmem %s28_s17, 24576  ;;  %p2131_p6 = scmp.lt.s32.totalorder %s28_s17, %s28_s17 }
  0x11   :  { %p2127_p5 = scmp.ne.s32.totalorder %s28_s17, %s2126_s18  ;;  %p2132_p7 = scmp.lt.s32.totalorder %s2126_s18, %s2126_s18 }
  0x13   :  { %p2133_p8 = por %p2132_p7, %p2131_p6 }
  0x15   :  { %p2134_p9 = pnand %p2133_p8, %p2127_p5 }
  0x17   :  { %2137 = shalt.err (!%p2134_p9)
}
  0x18   :  { %s2168_s19 = smov 256   ;;  %s2169_s20 = smov 16  }
  0x19   :  { %33 = dma.hbm_to_vmem [thread:$0]  %s2218_s1, 24576, %s28_s17, [#allocation6], %s2168_s19, %s2168_s19, %s2169_s20  }
  0x1a   :  { %2158 = dma.done.wait [#allocation3], 768  }
  0x1b   :  { %2159 = vsyncadd [#allocation3], 4294966528 }
  0x1c   :  { %2160 = dma.done.wait [#allocation6], 24576  }
  0x1d   :  { %2161 = vsyncadd [#allocation6], 4294942720  ;;  %v1797_v0 = vld [vmem:[#allocation5 + $0xe4] ss:$16 sps:$4 sm:$0xff]   ;;  %v1801_v2 = vld [vmem:[#allocation5 + $0xe0] ss:$16 sps:$4 sm:$0xff]  }
  0x1e   :  { %v1799_v1 = vld [vmem:[#allocation5 + $0x2e4] ss:$16 sps:$4 sm:$0xff]   ;;  %1248 = vmatprep.subr.bf16.mxu0 %v1797_v0  ;;  %v1802_v3 = vld [vmem:[#allocation5 + $0x2e0] ss:$16 sps:$4 sm:$0xff]   ;;  %s2170_s0 = smov [#allocation7]  }
  0x1f   :  { %1291 = vmatprep.subr.bf16.mxu1 %v1799_v1  ;;  %v1803_v4 = vld [vmem:[#allocation5 + $0xc4] ss:$16 sps:$4 sm:$0xff]   ;;  %1249 = vmatpush1.bf16.msra.mxu0 %v1801_v2  ;;  %v1807_v6 = vld [vmem:[#allocation5 + $0xc0] ss:$16 sps:$4 sm:$0xff]   ;;  %s1576_s1 = sshll.u32 %s2170_s0, 4  ;;  %s1577_s1 = int_to_ptr.vmem [resolvable:$true] %s1576_s1 }
  0x20   :  { %1292 = vmatpush1.bf16.msra.mxu1 %v1802_v3  ;;  %v1805_v5 = vld [vmem:[#allocation5 + $0x2c4] ss:$16 sps:$4 sm:$0xff]   ;;  %1250 = vmatprep.subr.bf16.mxu0 %v1803_v4  ;;  %v1808_v7 = vld [vmem:[#allocation5 + $0x2c0] ss:$16 sps:$4 sm:$0xff]   ;;  %v1904_v3 = vld [vmem:[#allocation5 + $0xec] ss:$16 sps:$4 sm:$0xff]   ;;  %p2143_p11 = scmp.lt.s32.totalorder %s1577_s1, %s1577_s1 }
  0x21   :  { %1293 = vmatprep.subr.bf16.mxu1 %v1805_v5  ;;  %v1809_v8 = vld [vmem:[#allocation5 + $0xa4] ss:$16 sps:$4 sm:$0xff]   ;;  %v1813_v10 = vld [vmem:[#allocation5 + $0xa0] ss:$16 sps:$4 sm:$0xff]   ;;  %s2138_s23 = scalar_lea.vmem %s1577_s1, 1024 }
  0x22   :  { %v1811_v9 = vld [vmem:[#allocation5 + $0x2a4] ss:$16 sps:$4 sm:$0xff]   ;;  %v1814_v11 = vld [vmem:[#allocation5 + $0x2a0] ss:$16 sps:$4 sm:$0xff]   ;;  %p2139_p10 = scmp.ne.s32.totalorder %s1577_s1, %s2138_s23  ;;  %p2144_p12 = scmp.lt.s32.totalorder %s2138_s23, %s2138_s23 }
  0x23   :  { %1251 = vmatpush1.bf16.msra.mxu0 %v1807_v6  ;;  %v1815_v12 = vld [vmem:[#allocation5 + $0x84] ss:$16 sps:$4 sm:$0xff]   ;;  %v1819_v14 = vld [vmem:[#allocation5 + $0x80] ss:$16 sps:$4 sm:$0xff]  }
  0x24   :  { %1294 = vmatpush1.bf16.msra.mxu1 %v1808_v7  ;;  %1252 = vmatprep.subr.bf16.mxu0 %v1809_v8  ;;  %v1817_v13 = vld [vmem:[#allocation5 + $0x284] ss:$16 sps:$4 sm:$0xff]   ;;  %v1820_v15 = vld [vmem:[#allocation5 + $0x280] ss:$16 sps:$4 sm:$0xff]   ;;  %v1902_v7 = vld [vmem:[#allocation5 + $0xe8] ss:$16 sps:$4 sm:$0xff]   ;;  %p2145_p13 = por %p2144_p12, %p2143_p11 }
  0x25   :  { %1295 = vmatprep.subr.bf16.mxu1 %v1811_v9  ;;  %v1821_v16 = vld [vmem:[#allocation5 + $0x64] ss:$16 sps:$4 sm:$0xff]   ;;  %v1825_v18 = vld [vmem:[#allocation5 + $0x60] ss:$16 sps:$4 sm:$0xff]   ;;  %v1910_v9 = vld [vmem:[#allocation5 + $0xcc] ss:$16 sps:$4 sm:$0xff]  }
  0x26   :  { %v1823_v17 = vld [vmem:[#allocation5 + $0x264] ss:$16 sps:$4 sm:$0xff]   ;;  %v1826_v19 = vld [vmem:[#allocation5 + $0x260] ss:$16 sps:$4 sm:$0xff]   ;;  %p2146_p0 = pnand %p2145_p13, %p2139_p10 }
  0x27   :  { %1253 = vmatpush1.bf16.msra.mxu0 %v1813_v10  ;;  %v1827_v20 = vld [vmem:[#allocation5 + $0x44] ss:$16 sps:$4 sm:$0xff]   ;;  %v1831_v22 = vld [vmem:[#allocation5 + $0x40] ss:$16 sps:$4 sm:$0xff]  }
  0x28   :  { %1296 = vmatpush1.bf16.msra.mxu1 %v1814_v11  ;;  %1254 = vmatprep.subr.bf16.mxu0 %v1815_v12  ;;  %v1829_v21 = vld [vmem:[#allocation5 + $0x244] ss:$16 sps:$4 sm:$0xff]   ;;  %v1832_v23 = vld [vmem:[#allocation5 + $0x240] ss:$16 sps:$4 sm:$0xff]   ;;  %v1908_v11 = vld [vmem:[#allocation5 + $0xc8] ss:$16 sps:$4 sm:$0xff]  }
  0x29   :  { %1297 = vmatprep.subr.bf16.mxu1 %v1817_v13  ;;  %v1833_v24 = vld [vmem:[#allocation5 + $0x24] ss:$16 sps:$4 sm:$0xff]   ;;  %v1837_v26 = vld [vmem:[#allocation5 + $0x20] ss:$16 sps:$4 sm:$0xff]   ;;  %v1916_v13 = vld [vmem:[#allocation5 + $0xac] ss:$16 sps:$4 sm:$0xff]  }
  0x2a   :  { %v1835_v25 = vld [vmem:[#allocation5 + $0x224] ss:$16 sps:$4 sm:$0xff]   ;;  %v1838_v27 = vld [vmem:[#allocation5 + $0x220] ss:$16 sps:$4 sm:$0xff]  }
  0x2b   :  { %1255 = vmatpush1.bf16.msra.mxu0 %v1819_v14  ;;  %v1839_v28 = vld [vmem:[#allocation5 + $0x4] ss:$16 sps:$4 sm:$0xff]   ;;  %v1843_v30 = vld [vmem:[#allocation5] ss:$16 sps:$4 sm:$0xff]  }
  0x2c   :  { %1298 = vmatpush1.bf16.msra.mxu1 %v1820_v15  ;;  %1256 = vmatprep.subr.bf16.mxu0 %v1821_v16  ;;  %v1841_v29 = vld [vmem:[#allocation5 + $0x204] ss:$16 sps:$4 sm:$0xff]   ;;  %v1844_v31 = vld [vmem:[#allocation5 + $0x200] ss:$16 sps:$4 sm:$0xff]   ;;  %v1914_v15 = vld [vmem:[#allocation5 + $0xa8] ss:$16 sps:$4 sm:$0xff]  }
  0x2d   :  { %1299 = vmatprep.subr.bf16.mxu1 %v1823_v17  ;;  %v1845_v32 = vld [vmem:[#allocation5 + $0x1e4] ss:$16 sps:$4 sm:$0xff]   ;;  %v1849_v34 = vld [vmem:[#allocation5 + $0x1e0] ss:$16 sps:$4 sm:$0xff]   ;;  %v1922_v17 = vld [vmem:[#allocation5 + $0x8c] ss:$16 sps:$4 sm:$0xff]  }
  0x2e   :  { %v1847_v33 = vld [vmem:[#allocation5 + $0x3e4] ss:$16 sps:$4 sm:$0xff]   ;;  %v1850_v35 = vld [vmem:[#allocation5 + $0x3e0] ss:$16 sps:$4 sm:$0xff]  }
  0x2f   :  { %1257 = vmatpush1.bf16.msra.mxu0 %v1825_v18  ;;  %v1851_v36 = vld [vmem:[#allocation5 + $0x1c4] ss:$16 sps:$4 sm:$0xff]   ;;  %v1855_v38 = vld [vmem:[#allocation5 + $0x1c0] ss:$16 sps:$4 sm:$0xff]  }
  0x30   :  { %1300 = vmatpush1.bf16.msra.mxu1 %v1826_v19  ;;  %1258 = vmatprep.subr.bf16.mxu0 %v1827_v20  ;;  %v1853_v37 = vld [vmem:[#allocation5 + $0x3c4] ss:$16 sps:$4 sm:$0xff]   ;;  %v1856_v39 = vld [vmem:[#allocation5 + $0x3c0] ss:$16 sps:$4 sm:$0xff]   ;;  %v1920_v19 = vld [vmem:[#allocation5 + $0x88] ss:$16 sps:$4 sm:$0xff]  }
  0x31   :  { %1301 = vmatprep.subr.bf16.mxu1 %v1829_v21  ;;  %v1857_v40 = vld [vmem:[#allocation5 + $0x1a4] ss:$16 sps:$4 sm:$0xff]   ;;  %v1861_v42 = vld [vmem:[#allocation5 + $0x1a0] ss:$16 sps:$4 sm:$0xff]   ;;  %v1928_v21 = vld [vmem:[#allocation5 + $0x6c] ss:$16 sps:$4 sm:$0xff]  }
  0x32   :  { %v1859_v41 = vld [vmem:[#allocation5 + $0x3a4] ss:$16 sps:$4 sm:$0xff]   ;;  %v1862_v43 = vld [vmem:[#allocation5 + $0x3a0] ss:$16 sps:$4 sm:$0xff]  }
  0x33   :  { %1259 = vmatpush1.bf16.msra.mxu0 %v1831_v22  ;;  %v1863_v44 = vld [vmem:[#allocation5 + $0x184] ss:$16 sps:$4 sm:$0xff]   ;;  %v1867_v46 = vld [vmem:[#allocation5 + $0x180] ss:$16 sps:$4 sm:$0xff]  }
  0x34   :  { %1302 = vmatpush1.bf16.msra.mxu1 %v1832_v23  ;;  %1260 = vmatprep.subr.bf16.mxu0 %v1833_v24  ;;  %v1865_v45 = vld [vmem:[#allocation5 + $0x384] ss:$16 sps:$4 sm:$0xff]   ;;  %v1868_v47 = vld [vmem:[#allocation5 + $0x380] ss:$16 sps:$4 sm:$0xff]   ;;  %v1926_v23 = vld [vmem:[#allocation5 + $0x68] ss:$16 sps:$4 sm:$0xff]  }
  0x35   :  { %1303 = vmatprep.subr.bf16.mxu1 %v1835_v25  ;;  %v1869_v48 = vld [vmem:[#allocation5 + $0x164] ss:$16 sps:$4 sm:$0xff]   ;;  %v1873_v52 = vld [vmem:[#allocation5 + $0x160] ss:$16 sps:$4 sm:$0xff]   ;;  %v1934_v25 = vld [vmem:[#allocation5 + $0x4c] ss:$16 sps:$4 sm:$0xff]  }
  0x36   :  { %v1895_v49 = vld [vmem:[#allocation2 + $0x4] ss:$24 sps:$4 sm:$0xff]   ;;  %v1874_v53 = vld [vmem:[#allocation5 + $0x360] ss:$16 sps:$4 sm:$0xff]  }
  0x37   :  { %1261 = vmatpush1.bf16.msra.mxu0 %v1837_v26  ;;  %v1871_v50 = vld [vmem:[#allocation5 + $0x364] ss:$16 sps:$4 sm:$0xff]   ;;  %1280 = vmatprep.mubr.bf16.mxu0 %v1895_v49  ;;  %v1879_v56 = vld [vmem:[#allocation5 + $0x140] ss:$16 sps:$4 sm:$0xff]  }
  0x38   :  { %1304 = vmatpush1.bf16.msra.mxu1 %v1838_v27  ;;  %1262 = vmatprep.subr.bf16.mxu0 %v1839_v28  ;;  %v2194_v51 = vld [vmem:[#allocation2 + $0xc] ss:$24 sps:$4 sm:$0xff]   ;;  %v1880_v57 = vld [vmem:[#allocation5 + $0x340] ss:$16 sps:$4 sm:$0xff]   ;;  %v1932_v27 = vld [vmem:[#allocation5 + $0x48] ss:$16 sps:$4 sm:$0xff]  }
  0x39   :  { %1305 = vmatprep.subr.bf16.mxu1 %v1841_v29  ;;  %1323 = vmatprep.mubr.bf16.mxu1 %v2194_v51  ;;  %v1875_v54 = vld [vmem:[#allocation5 + $0x144] ss:$16 sps:$4 sm:$0xff]   ;;  %v1885_v60 = vld [vmem:[#allocation5 + $0x120] ss:$16 sps:$4 sm:$0xff]   ;;  %v1940_v29 = vld [vmem:[#allocation5 + $0x2c] ss:$16 sps:$4 sm:$0xff]  }
  0x3a   :  { %v1877_v55 = vld [vmem:[#allocation5 + $0x344] ss:$16 sps:$4 sm:$0xff]   ;;  %v1886_v61 = vld [vmem:[#allocation5 + $0x320] ss:$16 sps:$4 sm:$0xff]  }
  0x3b   :  { %1263 = vmatpush1.bf16.msra.mxu0 %v1843_v30  ;;  %v1881_v58 = vld [vmem:[#allocation5 + $0x124] ss:$16 sps:$4 sm:$0xff]   ;;  %v1891_v0 = vld [vmem:[#allocation5 + $0x100] ss:$16 sps:$4 sm:$0xff]  }
  0x3c   :  { %1306 = vmatpush1.bf16.msra.mxu1 %v1844_v31  ;;  %1264 = vmatprep.subr.bf16.mxu0 %v1845_v32  ;;  %v1883_v59 = vld [vmem:[#allocation5 + $0x324] ss:$16 sps:$4 sm:$0xff]   ;;  %v1892_v1 = vld [vmem:[#allocation5 + $0x300] ss:$16 sps:$4 sm:$0xff]   ;;  %v1938_v31 = vld [vmem:[#allocation5 + $0x28] ss:$16 sps:$4 sm:$0xff]  }
  0x3d   :  { %1307 = vmatprep.subr.bf16.mxu1 %v1847_v33  ;;  %v1887_v62 = vld [vmem:[#allocation5 + $0x104] ss:$16 sps:$4 sm:$0xff]   ;;  %v2197_v4 = vld [vmem:[#allocation2] ss:$24 sps:$4 sm:$0xff]   ;;  %v1946_v33 = vld [vmem:[#allocation5 + $0xc] ss:$16 sps:$4 sm:$0xff]  }
  0x3e   :  { %v1889_v63 = vld [vmem:[#allocation5 + $0x304] ss:$16 sps:$4 sm:$0xff]   ;;  %v2199_v5 = vld [vmem:[#allocation2 + $0x8] ss:$24 sps:$4 sm:$0xff]  }
  0x3f   :  { %1265 = vmatpush2.bf16.msra.mxu0 %v1849_v34  ;;  %v1901_v2 = vld [vmem:[#allocation5 + $0x4e4] ss:$16 sps:$4 sm:$0xff]   ;;  %v1899_v6 = vld [vmem:[#allocation5 + $0x4e0] ss:$16 sps:$4 sm:$0xff]  }
  0x40   :  { %1308 = vmatpush2.bf16.msra.mxu1 %v1850_v35  ;;  %1266 = vmatprep.subr.bf16.mxu0 %v1851_v36  ;;  %v1907_v8 = vld [vmem:[#allocation5 + $0x4c4] ss:$16 sps:$4 sm:$0xff]   ;;  %v1905_v10 = vld [vmem:[#allocation5 + $0x4c0] ss:$16 sps:$4 sm:$0xff]   ;;  %v1944_v36 = vld [vmem:[#allocation5 + $0x8] ss:$16 sps:$4 sm:$0xff]  }
  0x41   :  { %1309 = vmatprep.subr.bf16.mxu1 %v1853_v37  ;;  %v1913_v12 = vld [vmem:[#allocation5 + $0x4a4] ss:$16 sps:$4 sm:$0xff]   ;;  %v1911_v14 = vld [vmem:[#allocation5 + $0x4a0] ss:$16 sps:$4 sm:$0xff]  }
  0x42   :  { %v1919_v16 = vld [vmem:[#allocation5 + $0x484] ss:$16 sps:$4 sm:$0xff]   ;;  %v1917_v18 = vld [vmem:[#allocation5 + $0x480] ss:$16 sps:$4 sm:$0xff]  }
  0x43   :  { %1267 = vmatpush2.bf16.msra.mxu0 %v1855_v38  ;;  %v1925_v20 = vld [vmem:[#allocation5 + $0x464] ss:$16 sps:$4 sm:$0xff]   ;;  %v1923_v22 = vld [vmem:[#allocation5 + $0x460] ss:$16 sps:$4 sm:$0xff]   ;;  %v1952_v38 = vld [vmem:[#allocation5 + $0x1ec] ss:$16 sps:$4 sm:$0xff]  }
  0x44   :  { %1310 = vmatpush2.bf16.msra.mxu1 %v1856_v39  ;;  %1268 = vmatprep.subr.bf16.mxu0 %v1857_v40  ;;  %v1931_v24 = vld [vmem:[#allocation5 + $0x444] ss:$16 sps:$4 sm:$0xff]   ;;  %v1929_v26 = vld [vmem:[#allocation5 + $0x440] ss:$16 sps:$4 sm:$0xff]   ;;  %v1950_v40 = vld [vmem:[#allocation5 + $0x1e8] ss:$16 sps:$4 sm:$0xff]  }
  0x45   :  { %1311 = vmatprep.subr.bf16.mxu1 %v1859_v41  ;;  %v1937_v28 = vld [vmem:[#allocation5 + $0x424] ss:$16 sps:$4 sm:$0xff]   ;;  %v1935_v30 = vld [vmem:[#allocation5 + $0x420] ss:$16 sps:$4 sm:$0xff]  }
  0x46   :  { %v1943_v32 = vld [vmem:[#allocation5 + $0x404] ss:$16 sps:$4 sm:$0xff]   ;;  %v1941_v35 = vld [vmem:[#allocation5 + $0x400] ss:$16 sps:$4 sm:$0xff]  }
  0x47   :  { %1269 = vmatpush2.bf16.msra.mxu0 %v1861_v42  ;;  %v2203_v34 = vld [vmem:[#allocation2 + $0x14] ss:$24 sps:$4 sm:$0xff]   ;;  %v1947_v39 = vld [vmem:[#allocation5 + $0x5e0] ss:$16 sps:$4 sm:$0xff]  }
  0x48   :  { %1312 = vmatpush2.bf16.msra.mxu1 %v1862_v43  ;;  %1270 = vmatprep.subr.bf16.mxu0 %v1863_v44  ;;  %v1949_v37 = vld [vmem:[#allocation5 + $0x5e4] ss:$16 sps:$4 sm:$0xff]   ;;  %v1958_v42 = vld [vmem:[#allocation5 + $0x1cc] ss:$16 sps:$4 sm:$0xff]   ;;  %v1953_v43 = vld [vmem:[#allocation5 + $0x5c0] ss:$16 sps:$4 sm:$0xff]  }
  0x49   :  { %1313 = vmatprep.subr.bf16.mxu1 %v1865_v45  ;;  %v1955_v41 = vld [vmem:[#allocation5 + $0x5c4] ss:$16 sps:$4 sm:$0xff]   ;;  %v1956_v44 = vld [vmem:[#allocation5 + $0x1c8] ss:$16 sps:$4 sm:$0xff]  }
  0x4a   :  { %v1961_v45 = vld [vmem:[#allocation5 + $0x5a4] ss:$16 sps:$4 sm:$0xff]  }
  0x4b   :  { %1271 = vmatpush2.bf16.msra.mxu0 %v1867_v46  ;;  %v1964_v46 = vld [vmem:[#allocation5 + $0x1ac] ss:$16 sps:$4 sm:$0xff]  }
  0x4c   :  { %1314 = vmatpush2.bf16.msra.mxu1 %v1868_v47  ;;  %1272 = vmatprep.subr.bf16.mxu0 %v1869_v48  ;;  %v1959_v47 = vld [vmem:[#allocation5 + $0x5a0] ss:$16 sps:$4 sm:$0xff]   ;;  %v1962_v48 = vld [vmem:[#allocation5 + $0x1a8] ss:$16 sps:$4 sm:$0xff]  }
  0x4d   :  { %1315 = vmatprep.subr.bf16.mxu1 %v1871_v50  ;;  %v1970_v50 = vld [vmem:[#allocation5 + $0x18c] ss:$16 sps:$4 sm:$0xff]  }
  0x4f   :  { %1273 = vmatpush2.bf16.msra.mxu0 %v1873_v52  ;;  %v1965_v52 = vld [vmem:[#allocation5 + $0x580] ss:$16 sps:$4 sm:$0xff]  }
  0x50   :  { %1316 = vmatpush2.bf16.msra.mxu1 %v1874_v53  ;;  %1274 = vmatprep.subr.bf16.mxu0 %v1875_v54  ;;  %v1968_v53 = vld [vmem:[#allocation5 + $0x188] ss:$16 sps:$4 sm:$0xff]   ;;  %v1973_v54 = vld [vmem:[#allocation5 + $0x564] ss:$16 sps:$4 sm:$0xff]  }
  0x51   :  { %1317 = vmatprep.subr.bf16.mxu1 %v1877_v55  ;;  %v1976_v55 = vld [vmem:[#allocation5 + $0x16c] ss:$16 sps:$4 sm:$0xff]  }
  0x53   :  { %1275 = vmatpush2.bf16.msra.mxu0 %v1879_v56  ;;  %v1971_v56 = vld [vmem:[#allocation5 + $0x560] ss:$16 sps:$4 sm:$0xff]  }
  0x54   :  { %1318 = vmatpush2.bf16.msra.mxu1 %v1880_v57  ;;  %1276 = vmatprep.subr.bf16.mxu0 %v1881_v58  ;;  %v1974_v57 = vld [vmem:[#allocation5 + $0x168] ss:$16 sps:$4 sm:$0xff]   ;;  %v1979_v58 = vld [vmem:[#allocation5 + $0x544] ss:$16 sps:$4 sm:$0xff]  }
  0x55   :  { %1319 = vmatprep.subr.bf16.mxu1 %v1883_v59  ;;  %v1982_v59 = vld [vmem:[#allocation5 + $0x14c] ss:$16 sps:$4 sm:$0xff]  }
  0x57   :  { %1277 = vmatpush2.bf16.msra.mxu0 %v1885_v60  ;;  %v1977_v60 = vld [vmem:[#allocation5 + $0x540] ss:$16 sps:$4 sm:$0xff]  }
  0x58   :  { %1320 = vmatpush2.bf16.msra.mxu1 %v1886_v61  ;;  %1278 = vmatprep.subr.bf16.mxu0 %v1887_v62  ;;  %v1980_v61 = vld [vmem:[#allocation5 + $0x148] ss:$16 sps:$4 sm:$0xff]   ;;  %v1985_v62 = vld [vmem:[#allocation5 + $0x524] ss:$16 sps:$4 sm:$0xff]  }
  0x59   :  { %1321 = vmatprep.subr.bf16.mxu1 %v1889_v63  ;;  %v1988_v63 = vld [vmem:[#allocation5 + $0x12c] ss:$16 sps:$4 sm:$0xff]  }
  0x5b   :  { %1279 = vmatpush2.bf16.msra.mxu0 %v1891_v0  ;;  %v1983_v0 = vld [vmem:[#allocation5 + $0x520] ss:$16 sps:$4 sm:$0xff]  }
  0x5c   :  { %1322 = vmatpush2.bf16.msra.mxu1 %v1892_v1  ;;  %1334 = vmatprep.subr.bf16.mxu0 %v1901_v2  ;;  %v1986_v1 = vld [vmem:[#allocation5 + $0x128] ss:$16 sps:$4 sm:$0xff]   ;;  %v1991_v2 = vld [vmem:[#allocation5 + $0x504] ss:$16 sps:$4 sm:$0xff]  }
  0x5d   :  { %1377 = vmatprep.subr.bf16.mxu1 %v1904_v3  ;;  %v1994_v3 = vld [vmem:[#allocation5 + $0x10c] ss:$16 sps:$4 sm:$0xff]  }
  0x5e   :  { %1281 = vmatmul.mubr.bf16.vlgmr.msra.gmra.mxu0 %v2197_v4 }
  0x5f   :  { %1324 = vmatmul.mubr.bf16.vlgmr.msra.gmra.mxu1 %v2199_v5  ;;  %1335 = vmatpush1.bf16.msra.mxu0 %v1899_v6  ;;  %v1989_v6 = vld [vmem:[#allocation5 + $0x500] ss:$16 sps:$4 sm:$0xff]  }
  0x60   :  { %1378 = vmatpush1.bf16.msra.mxu1 %v1902_v7  ;;  %1336 = vmatprep.subr.bf16.mxu0 %v1907_v8  ;;  %v1992_v7 = vld [vmem:[#allocation5 + $0x108] ss:$16 sps:$4 sm:$0xff]   ;;  %v2000_v8 = vld [vmem:[#allocation5 + $0x2ec] ss:$16 sps:$4 sm:$0xff]  }
  0x61   :  { %1379 = vmatprep.subr.bf16.mxu1 %v1910_v9  ;;  %1409 = vmatprep.mubr.bf16.mxu1 %v1895_v49  ;;  %v1967_v49 = vld [vmem:[#allocation5 + $0x584] ss:$16 sps:$4 sm:$0xff]   ;;  %v2003_v9 = vld [vmem:[#allocation5 + $0x4ec] ss:$16 sps:$4 sm:$0xff]  }
  0x62   :  { %1366 = vmatprep.mubr.bf16.mxu0 %v2203_v34 }
  0x63   :  { %1337 = vmatpush1.bf16.msra.mxu0 %v1905_v10  ;;  %v2206_v10 = vld [vmem:[#allocation2 + $0x10] ss:$24 sps:$4 sm:$0xff]  }
  0x64   :  { %1380 = vmatpush1.bf16.msra.mxu1 %v1908_v11  ;;  %1338 = vmatprep.subr.bf16.mxu0 %v1913_v12  ;;  %v1998_v11 = vld [vmem:[#allocation5 + $0x2e8] ss:$16 sps:$4 sm:$0xff]  }
  0x65   :  { %1381 = vmatprep.subr.bf16.mxu1 %v1916_v13  ;;  %v2001_v12 = vld [vmem:[#allocation5 + $0x4e8] ss:$16 sps:$4 sm:$0xff]   ;;  %v2006_v13 = vld [vmem:[#allocation5 + $0x2cc] ss:$16 sps:$4 sm:$0xff]  }
  0x67   :  { %1339 = vmatpush1.bf16.msra.mxu0 %v1911_v14  ;;  %v2009_v14 = vld [vmem:[#allocation5 + $0x4cc] ss:$16 sps:$4 sm:$0xff]  }
  0x68   :  { %1382 = vmatpush1.bf16.msra.mxu1 %v1914_v15  ;;  %1340 = vmatprep.subr.bf16.mxu0 %v1919_v16  ;;  %v2004_v15 = vld [vmem:[#allocation5 + $0x2c8] ss:$16 sps:$4 sm:$0xff]  }
  0x69   :  { %1383 = vmatprep.subr.bf16.mxu1 %v1922_v17  ;;  %v2007_v16 = vld [vmem:[#allocation5 + $0x4c8] ss:$16 sps:$4 sm:$0xff]   ;;  %v2012_v17 = vld [vmem:[#allocation5 + $0x2ac] ss:$16 sps:$4 sm:$0xff]  }
  0x6b   :  { %1341 = vmatpush1.bf16.msra.mxu0 %v1917_v18  ;;  %v2015_v18 = vld [vmem:[#allocation5 + $0x4ac] ss:$16 sps:$4 sm:$0xff]  }
  0x6c   :  { %1384 = vmatpush1.bf16.msra.mxu1 %v1920_v19  ;;  %1342 = vmatprep.subr.bf16.mxu0 %v1925_v20  ;;  %v2010_v19 = vld [vmem:[#allocation5 + $0x2a8] ss:$16 sps:$4 sm:$0xff]  }
  0x6d   :  { %1385 = vmatprep.subr.bf16.mxu1 %v1928_v21  ;;  %v2013_v20 = vld [vmem:[#allocation5 + $0x4a8] ss:$16 sps:$4 sm:$0xff]   ;;  %v2018_v21 = vld [vmem:[#allocation5 + $0x28c] ss:$16 sps:$4 sm:$0xff]  }
  0x6f   :  { %1343 = vmatpush1.bf16.msra.mxu0 %v1923_v22  ;;  %v2016_v22 = vld [vmem:[#allocation5 + $0x288] ss:$16 sps:$4 sm:$0xff]  }
  0x70   :  { %1386 = vmatpush1.bf16.msra.mxu1 %v1926_v23  ;;  %1344 = vmatprep.subr.bf16.mxu0 %v1931_v24  ;;  %v2019_v23 = vld [vmem:[#allocation5 + $0x488] ss:$16 sps:$4 sm:$0xff]   ;;  %v2024_v24 = vld [vmem:[#allocation5 + $0x26c] ss:$16 sps:$4 sm:$0xff]  }
  0x71   :  { %1387 = vmatprep.subr.bf16.mxu1 %v1934_v25  ;;  %v2027_v25 = vld [vmem:[#allocation5 + $0x46c] ss:$16 sps:$4 sm:$0xff]  }
  0x73   :  { %1345 = vmatpush1.bf16.msra.mxu0 %v1929_v26  ;;  %v2025_v26 = vld [vmem:[#allocation5 + $0x468] ss:$16 sps:$4 sm:$0xff]  }
  0x74   :  { %1388 = vmatpush1.bf16.msra.mxu1 %v1932_v27  ;;  %1346 = vmatprep.subr.bf16.mxu0 %v1937_v28  ;;  %v2030_v27 = vld [vmem:[#allocation5 + $0x24c] ss:$16 sps:$4 sm:$0xff]  }
  0x75   :  { %1389 = vmatprep.subr.bf16.mxu1 %v1940_v29  ;;  %v2033_v28 = vld [vmem:[#allocation5 + $0x44c] ss:$16 sps:$4 sm:$0xff]   ;;  %v2028_v29 = vld [vmem:[#allocation5 + $0x248] ss:$16 sps:$4 sm:$0xff]  }
  0x77   :  { %1347 = vmatpush1.bf16.msra.mxu0 %v1935_v30  ;;  %v2031_v30 = vld [vmem:[#allocation5 + $0x448] ss:$16 sps:$4 sm:$0xff]  }
  0x78   :  { %1390 = vmatpush1.bf16.msra.mxu1 %v1938_v31  ;;  %1348 = vmatprep.subr.bf16.mxu0 %v1943_v32  ;;  %v2036_v31 = vld [vmem:[#allocation5 + $0x22c] ss:$16 sps:$4 sm:$0xff]  }
  0x79   :  { %1391 = vmatprep.subr.bf16.mxu1 %v1946_v33  ;;  %v2039_v32 = vld [vmem:[#allocation5 + $0x42c] ss:$16 sps:$4 sm:$0xff]   ;;  %v2034_v33 = vld [vmem:[#allocation5 + $0x228] ss:$16 sps:$4 sm:$0xff]  }
  0x7b   :  { %1349 = vmatpush1.bf16.msra.mxu0 %v1941_v35  ;;  %v2042_v35 = vld [vmem:[#allocation5 + $0x20c] ss:$16 sps:$4 sm:$0xff]  }
  0x7c   :  { %1392 = vmatpush1.bf16.msra.mxu1 %v1944_v36  ;;  %1350 = vmatprep.subr.bf16.mxu0 %v1949_v37  ;;  %v2045_v36 = vld [vmem:[#allocation5 + $0x40c] ss:$16 sps:$4 sm:$0xff]   ;;  %v2040_v37 = vld [vmem:[#allocation5 + $0x208] ss:$16 sps:$4 sm:$0xff]  }
  0x7d   :  { %1393 = vmatprep.subr.bf16.mxu1 %v1952_v38  ;;  %v2043_v38 = vld [vmem:[#allocation5 + $0x408] ss:$16 sps:$4 sm:$0xff]  }
  0x7f   :  { %1351 = vmatpush2.bf16.msra.mxu0 %v1947_v39  ;;  %v2048_v39 = vld [vmem:[#allocation5 + $0x3ec] ss:$16 sps:$4 sm:$0xff]  }
  0x80   :  { %1394 = vmatpush2.bf16.msra.mxu1 %v1950_v40  ;;  %1352 = vmatprep.subr.bf16.mxu0 %v1955_v41  ;;  %v2051_v40 = vld [vmem:[#allocation5 + $0x5ec] ss:$16 sps:$4 sm:$0xff]   ;;  %v2046_v41 = vld [vmem:[#allocation5 + $0x3e8] ss:$16 sps:$4 sm:$0xff]  }
  0x81   :  { %1395 = vmatprep.subr.bf16.mxu1 %v1958_v42  ;;  %v2049_v42 = vld [vmem:[#allocation5 + $0x5e8] ss:$16 sps:$4 sm:$0xff]  }
  0x83   :  { %1353 = vmatpush2.bf16.msra.mxu0 %v1953_v43  ;;  %v2054_v43 = vld [vmem:[#allocation5 + $0x3cc] ss:$16 sps:$4 sm:$0xff]  }
  0x84   :  { %1396 = vmatpush2.bf16.msra.mxu1 %v1956_v44  ;;  %1354 = vmatprep.subr.bf16.mxu0 %v1961_v45  ;;  %v2057_v44 = vld [vmem:[#allocation5 + $0x5cc] ss:$16 sps:$4 sm:$0xff]   ;;  %v2052_v45 = vld [vmem:[#allocation5 + $0x3c8] ss:$16 sps:$4 sm:$0xff]  }
  0x85   :  { %1397 = vmatprep.subr.bf16.mxu1 %v1964_v46  ;;  %v2055_v46 = vld [vmem:[#allocation5 + $0x5c8] ss:$16 sps:$4 sm:$0xff]  }
  0x87   :  { %1355 = vmatpush2.bf16.msra.mxu0 %v1959_v47  ;;  %v2060_v47 = vld [vmem:[#allocation5 + $0x3ac] ss:$16 sps:$4 sm:$0xff]  }
  0x88   :  { %1398 = vmatpush2.bf16.msra.mxu1 %v1962_v48  ;;  %1356 = vmatprep.subr.bf16.mxu0 %v1967_v49  ;;  %v2063_v48 = vld [vmem:[#allocation5 + $0x5ac] ss:$16 sps:$4 sm:$0xff]   ;;  %v2058_v49 = vld [vmem:[#allocation5 + $0x3a8] ss:$16 sps:$4 sm:$0xff]  }
  0x89   :  { %1399 = vmatprep.subr.bf16.mxu1 %v1970_v50  ;;  %v2061_v50 = vld [vmem:[#allocation5 + $0x5a8] ss:$16 sps:$4 sm:$0xff]  }
  0x8b   :  { %1357 = vmatpush2.bf16.msra.mxu0 %v1965_v52  ;;  %v2066_v52 = vld [vmem:[#allocation5 + $0x38c] ss:$16 sps:$4 sm:$0xff]  }
  0x8c   :  { %1400 = vmatpush2.bf16.msra.mxu1 %v1968_v53  ;;  %1358 = vmatprep.subr.bf16.mxu0 %v1973_v54  ;;  %v2069_v53 = vld [vmem:[#allocation5 + $0x58c] ss:$16 sps:$4 sm:$0xff]   ;;  %v2064_v54 = vld [vmem:[#allocation5 + $0x388] ss:$16 sps:$4 sm:$0xff]  }
  0x8d   :  { %1401 = vmatprep.subr.bf16.mxu1 %v1976_v55  ;;  %v2067_v55 = vld [vmem:[#allocation5 + $0x588] ss:$16 sps:$4 sm:$0xff]  }
  0x8f   :  { %1359 = vmatpush2.bf16.msra.mxu0 %v1971_v56  ;;  %v2072_v56 = vld [vmem:[#allocation5 + $0x36c] ss:$16 sps:$4 sm:$0xff]  }
  0x90   :  { %1402 = vmatpush2.bf16.msra.mxu1 %v1974_v57  ;;  %1360 = vmatprep.subr.bf16.mxu0 %v1979_v58  ;;  %v2075_v57 = vld [vmem:[#allocation5 + $0x56c] ss:$16 sps:$4 sm:$0xff]   ;;  %v2070_v58 = vld [vmem:[#allocation5 + $0x368] ss:$16 sps:$4 sm:$0xff]  }
  0x91   :  { %1403 = vmatprep.subr.bf16.mxu1 %v1982_v59  ;;  %v2073_v59 = vld [vmem:[#allocation5 + $0x568] ss:$16 sps:$4 sm:$0xff]  }
  0x93   :  { %1361 = vmatpush2.bf16.msra.mxu0 %v1977_v60  ;;  %v2078_v60 = vld [vmem:[#allocation5 + $0x34c] ss:$16 sps:$4 sm:$0xff]  }
  0x94   :  { %1404 = vmatpush2.bf16.msra.mxu1 %v1980_v61  ;;  %1362 = vmatprep.subr.bf16.mxu0 %v1985_v62  ;;  %v2081_v61 = vld [vmem:[#allocation5 + $0x54c] ss:$16 sps:$4 sm:$0xff]   ;;  %v2076_v62 = vld [vmem:[#allocation5 + $0x348] ss:$16 sps:$4 sm:$0xff]  }
  0x95   :  { %1405 = vmatprep.subr.bf16.mxu1 %v1988_v63  ;;  %v2079_v63 = vld [vmem:[#allocation5 + $0x548] ss:$16 sps:$4 sm:$0xff]  }
  0x97   :  { %1363 = vmatpush2.bf16.msra.mxu0 %v1983_v0  ;;  %v2084_v0 = vld [vmem:[#allocation5 + $0x32c] ss:$16 sps:$4 sm:$0xff]  }
  0x98   :  { %1406 = vmatpush2.bf16.msra.mxu1 %v1986_v1  ;;  %1364 = vmatprep.subr.bf16.mxu0 %v1991_v2  ;;  %v2087_v1 = vld [vmem:[#allocation5 + $0x52c] ss:$16 sps:$4 sm:$0xff]   ;;  %v2082_v2 = vld [vmem:[#allocation5 + $0x328] ss:$16 sps:$4 sm:$0xff]  }
  0x99   :  { %1407 = vmatprep.subr.bf16.mxu1 %v1994_v3  ;;  %v2085_v3 = vld [vmem:[#allocation5 + $0x528] ss:$16 sps:$4 sm:$0xff]  }
  0x9b   :  { %1365 = vmatpush2.bf16.msra.mxu0 %v1989_v6  ;;  %v2090_v6 = vld [vmem:[#allocation5 + $0x30c] ss:$16 sps:$4 sm:$0xff]  }
  0x9c   :  { %1408 = vmatpush2.bf16.msra.mxu1 %v1992_v7  ;;  %1420 = vmatprep.subr.bf16.mxu0 %v2000_v8  ;;  %v2093_v7 = vld [vmem:[#allocation5 + $0x50c] ss:$16 sps:$4 sm:$0xff]   ;;  %v2088_v8 = vld [vmem:[#allocation5 + $0x308] ss:$16 sps:$4 sm:$0xff]  }
  0x9d   :  { %1463 = vmatprep.subr.bf16.mxu1 %v2003_v9  ;;  %v2091_v9 = vld [vmem:[#allocation5 + $0x508] ss:$16 sps:$4 sm:$0xff]  }
  0x9e   :  { %1367 = vmatmul.mubr.bf16.vlgmr.msra.gmra.mxu0 %v2206_v10 }
  0x9f   :  { %1410 = vmatmul.mubr.bf16.vlgmr.msra.gmra.mxu1 %v2197_v4  ;;  %1421 = vmatpush1.bf16.msra.mxu0 %v1998_v11  ;;  %v2021_v4 = vld [vmem:[#allocation5 + $0x48c] ss:$16 sps:$4 sm:$0xff]  }
  0xa0   :  { %1464 = vmatpush1.bf16.msra.mxu1 %v2001_v12  ;;  %1422 = vmatprep.subr.bf16.mxu0 %v2006_v13 }
  0xa1   :  { %1465 = vmatprep.subr.bf16.mxu1 %v2009_v14  ;;  %1452 = vmatprep.mubr.bf16.mxu0 %v2194_v51  ;;  %v2022_v51 = vld [vmem:[#allocation5 + $0x268] ss:$16 sps:$4 sm:$0xff]  }
  0xa2   :  { %1495 = vmatprep.mubr.bf16.mxu1 %v2203_v34  ;;  %v2037_v34 = vld [vmem:[#allocation5 + $0x428] ss:$16 sps:$4 sm:$0xff]  }
  0xa3   :  { %1423 = vmatpush1.bf16.msra.mxu0 %v2004_v15 }
  0xa4   :  { %1466 = vmatpush1.bf16.msra.mxu1 %v2007_v16  ;;  %1424 = vmatprep.subr.bf16.mxu0 %v2012_v17 }
  0xa5   :  { %1467 = vmatprep.subr.bf16.mxu1 %v2015_v18 }
  0xa7   :  { %1425 = vmatpush1.bf16.msra.mxu0 %v2010_v19 }
  0xa8   :  { %1468 = vmatpush1.bf16.msra.mxu1 %v2013_v20  ;;  %1426 = vmatprep.subr.bf16.mxu0 %v2018_v21 }
  0xa9   :  { %1469 = vmatprep.subr.bf16.mxu1 %v2021_v4 }
  0xab   :  { %1427 = vmatpush1.bf16.msra.mxu0 %v2016_v22 }
  0xac   :  { %1470 = vmatpush1.bf16.msra.mxu1 %v2019_v23  ;;  %1428 = vmatprep.subr.bf16.mxu0 %v2024_v24 }
  0xad   :  { %1471 = vmatprep.subr.bf16.mxu1 %v2027_v25 }
  0xaf   :  { %1429 = vmatpush1.bf16.msra.mxu0 %v2022_v51 }
  0xb0   :  { %1472 = vmatpush1.bf16.msra.mxu1 %v2025_v26  ;;  %1430 = vmatprep.subr.bf16.mxu0 %v2030_v27 }
  0xb1   :  { %1473 = vmatprep.subr.bf16.mxu1 %v2033_v28 }
  0xb3   :  { %1431 = vmatpush1.bf16.msra.mxu0 %v2028_v29 }
  0xb4   :  { %1474 = vmatpush1.bf16.msra.mxu1 %v2031_v30  ;;  %1432 = vmatprep.subr.bf16.mxu0 %v2036_v31 }
  0xb5   :  { %1475 = vmatprep.subr.bf16.mxu1 %v2039_v32 }
  0xb7   :  { %1433 = vmatpush1.bf16.msra.mxu0 %v2034_v33 }
  0xb8   :  { %1476 = vmatpush1.bf16.msra.mxu1 %v2037_v34  ;;  %1434 = vmatprep.subr.bf16.mxu0 %v2042_v35 }
  0xb9   :  { %1477 = vmatprep.subr.bf16.mxu1 %v2045_v36 }
  0xbb   :  { %1435 = vmatpush1.bf16.msra.mxu0 %v2040_v37 }
  0xbc   :  { %1478 = vmatpush1.bf16.msra.mxu1 %v2043_v38  ;;  %1436 = vmatprep.subr.bf16.mxu0 %v2048_v39 }
  0xbd   :  { %1479 = vmatprep.subr.bf16.mxu1 %v2051_v40 }
  0xbf   :  { %1437 = vmatpush2.bf16.msra.mxu0 %v2046_v41 }
  0xc0   :  { %1480 = vmatpush2.bf16.msra.mxu1 %v2049_v42  ;;  %1438 = vmatprep.subr.bf16.mxu0 %v2054_v43 }
  0xc1   :  { %1481 = vmatprep.subr.bf16.mxu1 %v2057_v44 }
  0xc3   :  { %1439 = vmatpush2.bf16.msra.mxu0 %v2052_v45 }
  0xc4   :  { %1482 = vmatpush2.bf16.msra.mxu1 %v2055_v46  ;;  %1440 = vmatprep.subr.bf16.mxu0 %v2060_v47 }
  0xc5   :  { %1483 = vmatprep.subr.bf16.mxu1 %v2063_v48 }
  0xc7   :  { %1441 = vmatpush2.bf16.msra.mxu0 %v2058_v49 }
  0xc8   :  { %1484 = vmatpush2.bf16.msra.mxu1 %v2061_v50  ;;  %1442 = vmatprep.subr.bf16.mxu0 %v2066_v52 }
  0xc9   :  { %1485 = vmatprep.subr.bf16.mxu1 %v2069_v53 }
  0xcb   :  { %1443 = vmatpush2.bf16.msra.mxu0 %v2064_v54 }
  0xcc   :  { %1486 = vmatpush2.bf16.msra.mxu1 %v2067_v55  ;;  %1444 = vmatprep.subr.bf16.mxu0 %v2072_v56 }
  0xcd   :  { %1487 = vmatprep.subr.bf16.mxu1 %v2075_v57 }
  0xcf   :  { %1445 = vmatpush2.bf16.msra.mxu0 %v2070_v58 }
  0xd0   :  { %1488 = vmatpush2.bf16.msra.mxu1 %v2073_v59  ;;  %1446 = vmatprep.subr.bf16.mxu0 %v2078_v60 }
  0xd1   :  { %1489 = vmatprep.subr.bf16.mxu1 %v2081_v61 }
  0xd3   :  { %1447 = vmatpush2.bf16.msra.mxu0 %v2076_v62 }
  0xd4   :  { %1490 = vmatpush2.bf16.msra.mxu1 %v2079_v63  ;;  %1448 = vmatprep.subr.bf16.mxu0 %v2084_v0 }
  0xd5   :  { %1491 = vmatprep.subr.bf16.mxu1 %v2087_v1 }
  0xd7   :  { %1449 = vmatpush2.bf16.msra.mxu0 %v2082_v2 }
  0xd8   :  { %1492 = vmatpush2.bf16.msra.mxu1 %v2085_v3  ;;  %1450 = vmatprep.subr.bf16.mxu0 %v2090_v6 }
  0xd9   :  { %1493 = vmatprep.subr.bf16.mxu1 %v2093_v7 }
  0xdb   :  { %1451 = vmatpush2.bf16.msra.mxu0 %v2088_v8 }
  0xdc   :  { %1494 = vmatpush2.bf16.msra.mxu1 %v2091_v9 }
  0xde   :  { %1453 = vmatmul.mubr.bf16.vlgmr.msra.gmra.mxu0 %v2199_v5 }
  0xdf   :  { %1496 = vmatmul.mubr.bf16.vlgmr.msra.gmra.mxu1 %v2206_v10 }
 0x11e   :  { %v1282_v11 = vpop.f32.mrf.mxu0 }
 0x11f   :  { %v1325_v12 = vpop.f32.mrf.mxu1 }
 0x120   :  { %v1284_v13 = vpop.f32.mrf.mxu0  ;;  %v1326_v24 = vadd.f32 %v1325_v12, %v1282_v11 }
 0x121   :  { %v1327_v14 = vpop.f32.mrf.mxu1 }
 0x122   :  { %v1286_v15 = vpop.f32.mrf.mxu0  ;;  %v1328_v23 = vadd.f32 %v1327_v14, %v1284_v13 }
 0x123   :  { %v1329_v16 = vpop.f32.mrf.mxu1 }
 0x124   :  { %v1288_v17 = vpop.f32.mrf.mxu0  ;;  %v1330_v27 = vadd.f32 %v1329_v16, %v1286_v15 }
 0x125   :  { %v1331_v19 = vpop.f32.mrf.mxu1 }
 0x126   :  { %v1332_v26 = vadd.f32 %v1331_v19, %v1288_v17 }
 0x15e   :  { %v1368_v18 = vpop.f32.mrf.mxu0 }
 0x15f   :  { %v1411_v20 = vpop.f32.mrf.mxu1  ;;  %v1369_v10 = vadd.f32 %v1368_v18, %v1326_v24 }
 0x160   :  { %v1370_v21 = vpop.f32.mrf.mxu0 }
 0x161   :  { %v1413_v4 = vpop.f32.mrf.mxu1  ;;  %v1371_v25 = vadd.f32 %v1370_v21, %v1328_v23  ;;  %v1533_v41 = vmul.f32 %v1369_v10, %v1369_v10 }
 0x162   :  { %v1372_v22 = vpop.f32.mrf.mxu0 }
 0x163   :  { %v1415_v51 = vpop.f32.mrf.mxu1  ;;  %v1373_v30 = vadd.f32 %v1372_v22, %v1330_v27  ;;  %v1534_v36 = vmul.f32 %v1371_v25, %v1371_v25 }
 0x164   :  { %v1374_v5 = vpop.f32.mrf.mxu0 }
 0x165   :  { %v1375_v28 = vadd.f32 %v1374_v5, %v1332_v26  ;;  %v1417_v29 = vpop.f32.mrf.mxu1  ;;  %v1541_v45 = vadd.f32 %v1534_v36, %v1533_v41  ;;  %v1537_v52 = vmul.f32 %v1373_v30, %v1373_v30 }
 0x167   :  { %v1538_v46 = vmul.f32 %v1375_v28, %v1375_v28 }
 0x169   :  { %v1546_v58 = vadd.f32 %v1538_v46, %v1537_v52 }
 0x19e   :  { %v1454_v31 = vpop.f32.mrf.mxu0 }
 0x19f   :  { %v1497_v32 = vpop.f32.mrf.mxu1  ;;  %v1455_v33 = vadd.f32 %v1454_v31, %v1411_v20 }
 0x1a0   :  { %v1456_v34 = vpop.f32.mrf.mxu0 }
 0x1a1   :  { %v1499_v35 = vpop.f32.mrf.mxu1  ;;  %v1498_v37 = vadd.f32 %v1497_v32, %v1455_v33  ;;  %v1457_v38 = vadd.f32 %v1456_v34, %v1413_v4 }
 0x1a2   :  { %v1458_v39 = vpop.f32.mrf.mxu0 }
 0x1a3   :  { %v1501_v40 = vpop.f32.mrf.mxu1  ;;  %v1500_v42 = vadd.f32 %v1499_v35, %v1457_v38  ;;  %v1459_v43 = vadd.f32 %v1458_v39, %v1415_v51  ;;  %v1535_v49 = vmul.f32 %v1498_v37, %v1498_v37 }
 0x1a4   :  { %v1460_v44 = vpop.f32.mrf.mxu0 }
 0x1a5   :  { %v1502_v47 = vadd.f32 %v1501_v40, %v1459_v43  ;;  %v1461_v48 = vadd.f32 %v1460_v44, %v1417_v29  ;;  %v1503_v50 = vpop.f32.mrf.mxu1  ;;  %v1536_v54 = vmul.f32 %v1500_v42, %v1500_v42  ;;  %v1542_v55 = vadd.f32 %v1541_v45, %v1535_v49 }
 0x1a7   :  { %v1504_v53 = vadd.f32 %v1503_v50, %v1461_v48  ;;  %v1543_v56 = vadd.f32 %v1542_v55, %v1536_v54  ;;  %v1539_v57 = vmul.f32 %v1502_v47, %v1502_v47 }
 0x1a9   :  { %1544 = vadd.xlane.f32.xlu0 %v1543_v56  ;;  %v1540_v59 = vmul.f32 %v1504_v53, %v1504_v53  ;;  %v1547_v60 = vadd.f32 %v1546_v58, %v1539_v57 }
 0x1ab   :  { %v1548_v61 = vadd.f32 %v1547_v60, %v1540_v59 }
 0x1ad   :  { %1549 = vadd.xlane.f32.xlu0 %v1548_v61 }
 0x232   :  { %v1545_v62 = vpop.xlane.xlu0 %1544 }
 0x233   :  { %v1551_v63 = vmax.f32 %v1545_v62, 1e-24 }
 0x235   :  { %2094 = vrsqrt.f32 %v1551_v63 }
 0x236   :  { %v1550_v0 = vpop.xlane.xlu0 %1549 }
 0x237   :  { %v1552_v1 = vmax.f32 %v1550_v0, 1e-24 }
 0x239   :  { %2096 = vrsqrt.f32 %v1552_v1 }
 0x242   :  { %v2095_v2 = vpop.eup %2094 }
 0x243   :  { %v1555_v3 = vmul.f32 %v2095_v2, %v1369_v10  ;;  %v1556_v6 = vmul.f32 %v2095_v2, %v1371_v25  ;;  %v1557_v7 = vmul.f32 %v2095_v2, %v1498_v37  ;;  %v1558_v8 = vmul.f32 %v2095_v2, %v1500_v42 }
 0x245   :  { %1563 = vst [vmem:[#allocation7] sm:$0xff] %v1555_v3  ;;  %1564 = vst [vmem:[#allocation7 + $0x8] sm:$0xff] %v1556_v6 }
 0x246   :  { %1565 = vst [vmem:[#allocation7 + $0x10] sm:$0xff] %v1557_v7  ;;  %1566 = vst [vmem:[#allocation7 + $0x18] sm:$0xff] %v1558_v8  ;;  %v2097_v9 = vpop.eup %2096 }
 0x247   :  { %v1559_v11 = vmul.f32 %v2097_v9, %v1373_v30  ;;  %v1560_v12 = vmul.f32 %v2097_v9, %v1375_v28  ;;  %v1561_v13 = vmul.f32 %v2097_v9, %v1502_v47  ;;  %v1562_v14 = vmul.f32 %v2097_v9, %v1504_v53 }
 0x249   :  { %1567 = vst [vmem:[#allocation7 + $0x20] sm:$0xff] %v1559_v11  ;;  %1568 = vst [vmem:[#allocation7 + $0x28] sm:$0xff] %v1560_v12 }
 0x24a   :  { %1569 = vst [vmem:[#allocation7 + $0x30] sm:$0xff] %v1561_v13  ;;  %1570 = vst [vmem:[#allocation7 + $0x38] sm:$0xff] %v1562_v14 }
 0x24b   :  { %2149 = shalt.err (!%p2146_p0)
}
 0x24c   :  { %s2171_s24 = smov 512   ;;  %s2172_s25 = smov 32  }
 0x24d   :  { %1582 = dma.vmem_to_hbm [thread:$0]  %s1577_s1, 1024, %s2219_s2, [#allocation4], %s2171_s24, %s2171_s24, %s2172_s25  }
 0x24e   :  { %2162 = dma.done.wait [#allocation4], 1024  }
 0x24f   :  { %2163 = vsyncadd [#allocation4], 4294966272 }
 0x250   :  { %1586 = vsyncpa [#allocation3], 1 }
 0x251   :  { %1587 = vsyncpa [#allocation6], 1 }
 0x252   :  { %1588 = vsyncpa [#allocation4], 1 }

</bundles_post_ra>
